<compile_context>
chip_gen: v5e
topology: v5e:2x2
jax: 0.10.0
libtpu: 0.0.40
codegen_flags: <defaults>
</compile_context>

<pallas_src>
import functools
import math

import jax
import jax.numpy as jnp
from jax.experimental import pallas as pl
from jax.experimental.pallas import tpu as pltpu


_VMEM = pl.BlockSpec(memory_space=pltpu.MemorySpace.VMEM)
_SMEM = pl.BlockSpec(memory_space=pltpu.MemorySpace.SMEM)


# ----------------------------- fused Pallas kernel ------------------------------

def _vi_bnn_kernel(
    x_ref,
    w1_mu_ref, w1_rho_ref, eps_w1_ref, b1_mu_ref, b1_rho_ref, eps_b1_ref,
    w2_mu_ref, w2_rho_ref, eps_w2_ref, b2_mu_ref, b2_rho_ref, eps_b2_ref,
    w3_mu_ref, w3_rho_ref, eps_w3_ref, b3_mu_ref, b3_rho_ref, eps_b3_ref,
    y_ref, kl_ref,
    *, prior_mu, prior_sigma, vpu_head,
):
    # Static prior constants (folded at trace time).
    log_prior_sigma = math.log(prior_sigma)
    inv_two_var = 0.5 / (prior_sigma * prior_sigma)

    def sample_and_kl(mu_ref, rho_ref, eps_ref):
        # Reparameterised sample + closed-form KL(N(mu, sig_q) || N(prior_mu, prior_sigma)).
        # softplus(rho) is computed ONCE and shared by both.
        mu = mu_ref[...]
        sig = jax.nn.softplus(rho_ref[...])           # exp/log -> EUP slot (free vs MXU)
        w = mu + sig * eps_ref[...]
        kl = jnp.sum(
            log_prior_sigma - jnp.log(sig)
            + (sig * sig + (mu - prior_mu) ** 2) * inv_two_var
            - 0.5
        )
        return w, kl

    w1, klw1 = sample_and_kl(w1_mu_ref, w1_rho_ref, eps_w1_ref)
    b1, klb1 = sample_and_kl(b1_mu_ref, b1_rho_ref, eps_b1_ref)
    w2, klw2 = sample_and_kl(w2_mu_ref, w2_rho_ref, eps_w2_ref)
    b2, klb2 = sample_and_kl(b2_mu_ref, b2_rho_ref, eps_b2_ref)
    w3, klw3 = sample_and_kl(w3_mu_ref, w3_rho_ref, eps_w3_ref)
    b3, klb3 = sample_and_kl(b3_mu_ref, b3_rho_ref, eps_b3_ref)

    # Hot path: two MXU matmuls + tanh (EUP), then the N=1 head on the VPU.
    h = jnp.tanh(jnp.dot(x_ref[...], w1, preferred_element_type=jnp.float32) + b1)
    h = jnp.tanh(jnp.dot(h, w2, preferred_element_type=jnp.float32) + b2)

    if vpu_head:
        # output_size == 1: w3 params arrive pre-transposed as (1, hidden).
        # VPU broadcast-multiply + lane reduction avoids the MXU round-trip for N=1.
        y = jnp.sum(h * w3, axis=-1, keepdims=True) + b3
    else:
        y = jnp.dot(h, w3, preferred_element_type=jnp.float32) + b3

    y_ref[...] = y.astype(y_ref.dtype)
    # Single scalar KL writeback (total over all 3 layers, weights + biases).
    kl_ref[0] = klw1 + klb1 + klw2 + klb2 + klw3 + klb3


# ------------------------------ JAX wrapper (jitted) -----------------------------

def _fused_forward(x, layers, key, *, prior_mu, prior_sigma):
    l1, l2, l3 = layers
    out_dim = l3["w_mu"].shape[1]
    vpu_head = (out_dim == 1)

    # eps draws: tiny fused XLA RNG ops under the same jit as the kernel launch.
    keys = jax.random.split(key, 6)
    eps_w1 = jax.random.normal(keys[0], l1["w_mu"].shape, jnp.float32)
    eps_b1 = jax.random.normal(keys[1], l1["b_mu"].shape, jnp.float32)
    eps_w2 = jax.random.normal(keys[2], l2["w_mu"].shape, jnp.float32)
    eps_b2 = jax.random.normal(keys[3], l2["b_mu"].shape, jnp.float32)
    eps_w3 = jax.random.normal(keys[4], l3["w_mu"].shape, jnp.float32)
    eps_b3 = jax.random.normal(keys[5], l3["b_mu"].shape, jnp.float32)

    if vpu_head:
        # Present the output head lane-dense: (out=1, hidden) instead of (hidden, 1).
        w3_mu, w3_rho, eps_w3_k = l3["w_mu"].T, l3["w_rho"].T, eps_w3.T
    else:
        w3_mu, w3_rho, eps_w3_k = l3["w_mu"], l3["w_rho"], eps_w3

    kernel = functools.partial(
        _vi_bnn_kernel,
        prior_mu=float(prior_mu), prior_sigma=float(prior_sigma), vpu_head=vpu_head,
    )

    batch = x.shape[0]
    y, kl = pl.pallas_call(
        kernel,
        out_shape=(
            jax.ShapeDtypeStruct((batch, out_dim), jnp.float32),
            jax.ShapeDtypeStruct((1,), jnp.float32),
        ),
        in_specs=[_VMEM] * 19,
        out_specs=(_VMEM, _SMEM),
    )(
        x,
        l1["w_mu"], l1["w_rho"], eps_w1, l1["b_mu"], l1["b_rho"], eps_b1,
        l2["w_mu"], l2["w_rho"], eps_w2, l2["b_mu"], l2["b_rho"], eps_b2,
        w3_mu, w3_rho, eps_w3_k, l3["b_mu"], l3["b_rho"], eps_b3,
    )
    return y, kl[0]


# ------------------------------- VI_BNN model -------------------------------

class VI_BNN_Pallas:
    """JAX/Pallas equivalent of the PyTorch VI_BNN forward pass (fused single kernel)."""

    def __init__(self, input_size=13, num_nodes=10, output_size=1, alpha=1.0, kl_beta=1.0,
                 key=jax.random.PRNGKey(0)):
        self.input_size = input_size
        self.num_nodes = num_nodes
        self.output_size = output_size
        self.kl_beta = kl_beta
        self.prior_mu = 0.0
        self.prior_sigma = 1.0 / alpha ** 0.5

        dims = [(input_size, num_nodes), (num_nodes, num_nodes), (num_nodes, output_size)]
        keys = jax.random.split(key, len(dims))
        self.layers = []
        for (n_in, n_out), k in zip(dims, keys):
            k_w, k_b = jax.random.split(k)
            # deterministic synthetic init (mirrors typical BBPLinear init: small-N mu, rho=-3)
            w_mu = 0.1 * jax.random.normal(k_w, (n_in, n_out), dtype=jnp.float32)
            w_rho = jnp.full((n_in, n_out), -3.0, dtype=jnp.float32)
            b_mu = 0.1 * jax.random.normal(k_b, (1, n_out), dtype=jnp.float32)
            b_rho = jnp.full((1, n_out), -3.0, dtype=jnp.float32)
            self.layers.append(dict(w_mu=w_mu, w_rho=w_rho, b_mu=b_mu, b_rho=b_rho))

        # One jitted forward: eps draws + single fused pallas_call.
        self._forward = jax.jit(functools.partial(
            _fused_forward, prior_mu=self.prior_mu, prior_sigma=self.prior_sigma))

    def forward(self, x, key):
        return self._forward(x, self.layers, key)


# ------------------------- pure-JAX reference (for checking) -------------------------

def _reference_forward(x, layers, key, prior_mu, prior_sigma):
    l1, l2, l3 = layers
    keys = jax.random.split(key, 6)
    order = [l1["w_mu"], l1["b_mu"], l2["w_mu"], l2["b_mu"], l3["w_mu"], l3["b_mu"]]
    eps = [jax.random.normal(k, p.shape, jnp.float32) for k, p in zip(keys, order)]

    def sample(mu, rho, e):
        return mu + jax.nn.softplus(rho) * e

    def kl(mu, rho):
        sig = jax.nn.softplus(rho)
        return jnp.sum(jnp.log(prior_sigma) - jnp.log(sig)
                       + (sig * sig + (mu - prior_mu) ** 2) / (2.0 * prior_sigma ** 2) - 0.5)

    w1 = sample(l1["w_mu"], l1["w_rho"], eps[0]); b1 = sample(l1["b_mu"], l1["b_rho"], eps[1])
    w2 = sample(l2["w_mu"], l2["w_rho"], eps[2]); b2 = sample(l2["b_mu"], l2["b_rho"], eps[3])
    w3 = sample(l3["w_mu"], l3["w_rho"], eps[4]); b3 = sample(l3["b_mu"], l3["b_rho"], eps[5])

    h = jnp.tanh(x @ w1 + b1)
    h = jnp.tanh(h @ w2 + b2)
    y = h @ w3 + b3
    kld = (kl(l1["w_mu"], l1["w_rho"]) + kl(l1["b_mu"], l1["b_rho"])
           + kl(l2["w_mu"], l2["w_rho"]) + kl(l2["b_mu"], l2["b_rho"])
           + kl(l3["w_mu"], l3["w_rho"]) + kl(l3["b_mu"], l3["b_rho"]))
    return y, kld


# ---------------------------------- main -------------------------------------

if __name__ == "__main__":
    key = jax.random.PRNGKey(0)
    k_params, k_x, k_sample = jax.random.split(key, 3)

    batch = 8
    input_size, num_nodes, output_size = 13, 10, 1

    model = VI_BNN_Pallas(input_size=input_size, num_nodes=num_nodes,
                          output_size=output_size, alpha=1.0, key=k_params)

    x = jax.random.normal(k_x, (batch, input_size), dtype=jnp.float32)

    y, kld = model.forward(x, k_sample)
    y = jax.block_until_ready(y)
    kld = jax.block_until_ready(kld)

    assert y.shape == (batch, output_size)
    assert kld.shape == ()
    assert bool(jnp.all(jnp.isfinite(y))) and bool(jnp.isfinite(kld))

    # Numerical check against a pure-JAX reference using the same eps draws.
    y_ref, kld_ref = _reference_forward(x, model.layers, k_sample,
                                        model.prior_mu, model.prior_sigma)
    assert jnp.allclose(y, y_ref, rtol=1e-4, atol=1e-5), (y, y_ref)
    assert jnp.allclose(kld, kld_ref, rtol=1e-4, atol=1e-4), (kld, kld_ref)

    print("KERNEL_OK")
</pallas_src>

<mosaic_0001>
module attributes {stable_mosaic.version = 11 : i64} {
  func.func @_vi_bnn_kernel(%arg0: memref<8x13xf32, #tpu.memory_space<vmem>>, %arg1: memref<13x10xf32, #tpu.memory_space<vmem>>, %arg2: memref<13x10xf32, #tpu.memory_space<vmem>>, %arg3: memref<13x10xf32, #tpu.memory_space<vmem>>, %arg4: memref<1x10xf32, #tpu.memory_space<vmem>>, %arg5: memref<1x10xf32, #tpu.memory_space<vmem>>, %arg6: memref<1x10xf32, #tpu.memory_space<vmem>>, %arg7: memref<10x10xf32, #tpu.memory_space<vmem>>, %arg8: memref<10x10xf32, #tpu.memory_space<vmem>>, %arg9: memref<10x10xf32, #tpu.memory_space<vmem>>, %arg10: memref<1x10xf32, #tpu.memory_space<vmem>>, %arg11: memref<1x10xf32, #tpu.memory_space<vmem>>, %arg12: memref<1x10xf32, #tpu.memory_space<vmem>>, %arg13: memref<1x10xf32, #tpu.memory_space<vmem>>, %arg14: memref<1x10xf32, #tpu.memory_space<vmem>>, %arg15: memref<1x10xf32, #tpu.memory_space<vmem>>, %arg16: memref<1x1xf32, #tpu.memory_space<vmem>>, %arg17: memref<1x1xf32, #tpu.memory_space<vmem>>, %arg18: memref<1x1xf32, #tpu.memory_space<vmem>>, %arg19: memref<8x1xf32, #tpu.memory_space<vmem>>, %arg20: memref<1xf32, #tpu.memory_space<smem>>) attributes {dimension_semantics = [], scalar_prefetch = 0 : i64, scratch_operands = 0 : i64, tpu.core_type = #tpu.core_type<tc>} {
    %c0 = arith.constant 0 : index
    %c0_0 = arith.constant 0 : index
    %0 = vector.load %arg1[%c0, %c0_0] : memref<13x10xf32, #tpu.memory_space<vmem>>, vector<13x10xf32>
    %c0_1 = arith.constant 0 : index
    %c0_2 = arith.constant 0 : index
    %1 = vector.load %arg2[%c0_1, %c0_2] : memref<13x10xf32, #tpu.memory_space<vmem>>, vector<13x10xf32>
    %cst = arith.constant 0.000000e+00 : f32
    %2 = vector.broadcast %cst : f32 to vector<13x10xf32>
    %3 = arith.maximumf %1, %2 : vector<13x10xf32>
    %4 = vector.broadcast %cst : f32 to vector<13x10xf32>
    %5 = arith.subf %1, %4 : vector<13x10xf32>
    %6 = arith.cmpf one, %5, %5 : vector<13x10xf32>
    %7 = vector.broadcast %cst : f32 to vector<13x10xf32>
    %8 = arith.addf %1, %7 : vector<13x10xf32>
    %9 = math.absf %5 : vector<13x10xf32>
    %cst_3 = arith.constant 0.000000e+00 : f32
    %10 = vector.broadcast %cst_3 : f32 to vector<13x10xf32>
    %11 = arith.subf %10, %9 : vector<13x10xf32>
    %12 = math.exp %11 : vector<13x10xf32>
    %13 = math.log1p %12 : vector<13x10xf32>
    %14 = arith.addf %3, %13 : vector<13x10xf32>
    %15 = arith.select %6, %8, %14 : vector<13x10xi1>, vector<13x10xf32>
    %c0_4 = arith.constant 0 : index
    %c0_5 = arith.constant 0 : index
    %16 = vector.load %arg3[%c0_4, %c0_5] : memref<13x10xf32, #tpu.memory_space<vmem>>, vector<13x10xf32>
    %17 = arith.mulf %15, %16 : vector<13x10xf32>
    %18 = arith.addf %0, %17 : vector<13x10xf32>
    %19 = math.log %15 : vector<13x10xf32>
    %cst_6 = arith.constant 0.000000e+00 : f32
    %20 = vector.broadcast %cst_6 : f32 to vector<13x10xf32>
    %21 = arith.subf %20, %19 : vector<13x10xf32>
    %22 = arith.mulf %15, %15 : vector<13x10xf32>
    %cst_7 = arith.constant 0.000000e+00 : f32
    %23 = vector.broadcast %cst_7 : f32 to vector<13x10xf32>
    %24 = arith.subf %0, %23 : vector<13x10xf32>
    %25 = arith.mulf %24, %24 : vector<13x10xf32>
    %26 = arith.addf %22, %25 : vector<13x10xf32>
    %cst_8 = arith.constant 5.000000e-01 : f32
    %27 = vector.broadcast %cst_8 : f32 to vector<13x10xf32>
    %28 = arith.mulf %26, %27 : vector<13x10xf32>
    %29 = arith.addf %21, %28 : vector<13x10xf32>
    %cst_9 = arith.constant 5.000000e-01 : f32
    %30 = vector.broadcast %cst_9 : f32 to vector<13x10xf32>
    %31 = arith.subf %29, %30 : vector<13x10xf32>
    %32 = vector.shape_cast %31 : vector<13x10xf32> to vector<1x13x10xf32>
    %cst_10 = arith.constant dense<0.000000e+00> : vector<1xf32>
    %33 = vector.multi_reduction <add>, %32, %cst_10 [1, 2] : vector<1x13x10xf32> to vector<1xf32>
    %34 = vector.shape_cast %33 : vector<1xf32> to vector<1x1x1xf32>
    %35 = vector.extract %34[0, 0, 0] : f32 from vector<1x1x1xf32>
    %c0_11 = arith.constant 0 : index
    %c0_12 = arith.constant 0 : index
    %36 = vector.load %arg4[%c0_11, %c0_12] : memref<1x10xf32, #tpu.memory_space<vmem>>, vector<1x10xf32>
    %c0_13 = arith.constant 0 : index
    %c0_14 = arith.constant 0 : index
    %37 = vector.load %arg5[%c0_13, %c0_14] : memref<1x10xf32, #tpu.memory_space<vmem>>, vector<1x10xf32>
    %cst_15 = arith.constant 0.000000e+00 : f32
    %38 = vector.broadcast %cst_15 : f32 to vector<1x10xf32>
    %39 = arith.maximumf %37, %38 : vector<1x10xf32>
    %40 = vector.broadcast %cst_15 : f32 to vector<1x10xf32>
    %41 = arith.subf %37, %40 : vector<1x10xf32>
    %42 = arith.cmpf one, %41, %41 : vector<1x10xf32>
    %43 = vector.broadcast %cst_15 : f32 to vector<1x10xf32>
    %44 = arith.addf %37, %43 : vector<1x10xf32>
    %45 = math.absf %41 : vector<1x10xf32>
    %cst_16 = arith.constant 0.000000e+00 : f32
    %46 = vector.broadcast %cst_16 : f32 to vector<1x10xf32>
    %47 = arith.subf %46, %45 : vector<1x10xf32>
    %48 = math.exp %47 : vector<1x10xf32>
    %49 = math.log1p %48 : vector<1x10xf32>
    %50 = arith.addf %39, %49 : vector<1x10xf32>
    %51 = arith.select %42, %44, %50 : vector<1x10xi1>, vector<1x10xf32>
    %c0_17 = arith.constant 0 : index
    %c0_18 = arith.constant 0 : index
    %52 = vector.load %arg6[%c0_17, %c0_18] : memref<1x10xf32, #tpu.memory_space<vmem>>, vector<1x10xf32>
    %53 = arith.mulf %51, %52 : vector<1x10xf32>
    %54 = arith.addf %36, %53 : vector<1x10xf32>
    %55 = math.log %51 : vector<1x10xf32>
    %cst_19 = arith.constant 0.000000e+00 : f32
    %56 = vector.broadcast %cst_19 : f32 to vector<1x10xf32>
    %57 = arith.subf %56, %55 : vector<1x10xf32>
    %58 = arith.mulf %51, %51 : vector<1x10xf32>
    %cst_20 = arith.constant 0.000000e+00 : f32
    %59 = vector.broadcast %cst_20 : f32 to vector<1x10xf32>
    %60 = arith.subf %36, %59 : vector<1x10xf32>
    %61 = arith.mulf %60, %60 : vector<1x10xf32>
    %62 = arith.addf %58, %61 : vector<1x10xf32>
    %cst_21 = arith.constant 5.000000e-01 : f32
    %63 = vector.broadcast %cst_21 : f32 to vector<1x10xf32>
    %64 = arith.mulf %62, %63 : vector<1x10xf32>
    %65 = arith.addf %57, %64 : vector<1x10xf32>
    %cst_22 = arith.constant 5.000000e-01 : f32
    %66 = vector.broadcast %cst_22 : f32 to vector<1x10xf32>
    %67 = arith.subf %65, %66 : vector<1x10xf32>
    %68 = vector.shape_cast %67 : vector<1x10xf32> to vector<1x1x10xf32>
    %cst_23 = arith.constant dense<0.000000e+00> : vector<1xf32>
    %69 = vector.multi_reduction <add>, %68, %cst_23 [1, 2] : vector<1x1x10xf32> to vector<1xf32>
    %70 = vector.shape_cast %69 : vector<1xf32> to vector<1x1x1xf32>
    %71 = vector.extract %70[0, 0, 0] : f32 from vector<1x1x1xf32>
    %c0_24 = arith.constant 0 : index
    %c0_25 = arith.constant 0 : index
    %72 = vector.load %arg7[%c0_24, %c0_25] : memref<10x10xf32, #tpu.memory_space<vmem>>, vector<10x10xf32>
    %c0_26 = arith.constant 0 : index
    %c0_27 = arith.constant 0 : index
    %73 = vector.load %arg8[%c0_26, %c0_27] : memref<10x10xf32, #tpu.memory_space<vmem>>, vector<10x10xf32>
    %cst_28 = arith.constant 0.000000e+00 : f32
    %74 = vector.broadcast %cst_28 : f32 to vector<10x10xf32>
    %75 = arith.maximumf %73, %74 : vector<10x10xf32>
    %76 = vector.broadcast %cst_28 : f32 to vector<10x10xf32>
    %77 = arith.subf %73, %76 : vector<10x10xf32>
    %78 = arith.cmpf one, %77, %77 : vector<10x10xf32>
    %79 = vector.broadcast %cst_28 : f32 to vector<10x10xf32>
    %80 = arith.addf %73, %79 : vector<10x10xf32>
    %81 = math.absf %77 : vector<10x10xf32>
    %cst_29 = arith.constant 0.000000e+00 : f32
    %82 = vector.broadcast %cst_29 : f32 to vector<10x10xf32>
    %83 = arith.subf %82, %81 : vector<10x10xf32>
    %84 = math.exp %83 : vector<10x10xf32>
    %85 = math.log1p %84 : vector<10x10xf32>
    %86 = arith.addf %75, %85 : vector<10x10xf32>
    %87 = arith.select %78, %80, %86 : vector<10x10xi1>, vector<10x10xf32>
    %c0_30 = arith.constant 0 : index
    %c0_31 = arith.constant 0 : index
    %88 = vector.load %arg9[%c0_30, %c0_31] : memref<10x10xf32, #tpu.memory_space<vmem>>, vector<10x10xf32>
    %89 = arith.mulf %87, %88 : vector<10x10xf32>
    %90 = arith.addf %72, %89 : vector<10x10xf32>
    %91 = math.log %87 : vector<10x10xf32>
    %cst_32 = arith.constant 0.000000e+00 : f32
    %92 = vector.broadcast %cst_32 : f32 to vector<10x10xf32>
    %93 = arith.subf %92, %91 : vector<10x10xf32>
    %94 = arith.mulf %87, %87 : vector<10x10xf32>
    %cst_33 = arith.constant 0.000000e+00 : f32
    %95 = vector.broadcast %cst_33 : f32 to vector<10x10xf32>
    %96 = arith.subf %72, %95 : vector<10x10xf32>
    %97 = arith.mulf %96, %96 : vector<10x10xf32>
    %98 = arith.addf %94, %97 : vector<10x10xf32>
    %cst_34 = arith.constant 5.000000e-01 : f32
    %99 = vector.broadcast %cst_34 : f32 to vector<10x10xf32>
    %100 = arith.mulf %98, %99 : vector<10x10xf32>
    %101 = arith.addf %93, %100 : vector<10x10xf32>
    %cst_35 = arith.constant 5.000000e-01 : f32
    %102 = vector.broadcast %cst_35 : f32 to vector<10x10xf32>
    %103 = arith.subf %101, %102 : vector<10x10xf32>
    %104 = vector.shape_cast %103 : vector<10x10xf32> to vector<1x10x10xf32>
    %cst_36 = arith.constant dense<0.000000e+00> : vector<1xf32>
    %105 = vector.multi_reduction <add>, %104, %cst_36 [1, 2] : vector<1x10x10xf32> to vector<1xf32>
    %106 = vector.shape_cast %105 : vector<1xf32> to vector<1x1x1xf32>
    %107 = vector.extract %106[0, 0, 0] : f32 from vector<1x1x1xf32>
    %c0_37 = arith.constant 0 : index
    %c0_38 = arith.constant 0 : index
    %108 = vector.load %arg10[%c0_37, %c0_38] : memref<1x10xf32, #tpu.memory_space<vmem>>, vector<1x10xf32>
    %c0_39 = arith.constant 0 : index
    %c0_40 = arith.constant 0 : index
    %109 = vector.load %arg11[%c0_39, %c0_40] : memref<1x10xf32, #tpu.memory_space<vmem>>, vector<1x10xf32>
    %cst_41 = arith.constant 0.000000e+00 : f32
    %110 = vector.broadcast %cst_41 : f32 to vector<1x10xf32>
    %111 = arith.maximumf %109, %110 : vector<1x10xf32>
    %112 = vector.broadcast %cst_41 : f32 to vector<1x10xf32>
    %113 = arith.subf %109, %112 : vector<1x10xf32>
    %114 = arith.cmpf one, %113, %113 : vector<1x10xf32>
    %115 = vector.broadcast %cst_41 : f32 to vector<1x10xf32>
    %116 = arith.addf %109, %115 : vector<1x10xf32>
    %117 = math.absf %113 : vector<1x10xf32>
    %cst_42 = arith.constant 0.000000e+00 : f32
    %118 = vector.broadcast %cst_42 : f32 to vector<1x10xf32>
    %119 = arith.subf %118, %117 : vector<1x10xf32>
    %120 = math.exp %119 : vector<1x10xf32>
    %121 = math.log1p %120 : vector<1x10xf32>
    %122 = arith.addf %111, %121 : vector<1x10xf32>
    %123 = arith.select %114, %116, %122 : vector<1x10xi1>, vector<1x10xf32>
    %c0_43 = arith.constant 0 : index
    %c0_44 = arith.constant 0 : index
    %124 = vector.load %arg12[%c0_43, %c0_44] : memref<1x10xf32, #tpu.memory_space<vmem>>, vector<1x10xf32>
    %125 = arith.mulf %123, %124 : vector<1x10xf32>
    %126 = arith.addf %108, %125 : vector<1x10xf32>
    %127 = math.log %123 : vector<1x10xf32>
    %cst_45 = arith.constant 0.000000e+00 : f32
    %128 = vector.broadcast %cst_45 : f32 to vector<1x10xf32>
    %129 = arith.subf %128, %127 : vector<1x10xf32>
    %130 = arith.mulf %123, %123 : vector<1x10xf32>
    %cst_46 = arith.constant 0.000000e+00 : f32
    %131 = vector.broadcast %cst_46 : f32 to vector<1x10xf32>
    %132 = arith.subf %108, %131 : vector<1x10xf32>
    %133 = arith.mulf %132, %132 : vector<1x10xf32>
    %134 = arith.addf %130, %133 : vector<1x10xf32>
    %cst_47 = arith.constant 5.000000e-01 : f32
    %135 = vector.broadcast %cst_47 : f32 to vector<1x10xf32>
    %136 = arith.mulf %134, %135 : vector<1x10xf32>
    %137 = arith.addf %129, %136 : vector<1x10xf32>
    %cst_48 = arith.constant 5.000000e-01 : f32
    %138 = vector.broadcast %cst_48 : f32 to vector<1x10xf32>
    %139 = arith.subf %137, %138 : vector<1x10xf32>
    %140 = vector.shape_cast %139 : vector<1x10xf32> to vector<1x1x10xf32>
    %cst_49 = arith.constant dense<0.000000e+00> : vector<1xf32>
    %141 = vector.multi_reduction <add>, %140, %cst_49 [1, 2] : vector<1x1x10xf32> to vector<1xf32>
    %142 = vector.shape_cast %141 : vector<1xf32> to vector<1x1x1xf32>
    %143 = vector.extract %142[0, 0, 0] : f32 from vector<1x1x1xf32>
    %c0_50 = arith.constant 0 : index
    %c0_51 = arith.constant 0 : index
    %144 = vector.load %arg13[%c0_50, %c0_51] : memref<1x10xf32, #tpu.memory_space<vmem>>, vector<1x10xf32>
    %c0_52 = arith.constant 0 : index
    %c0_53 = arith.constant 0 : index
    %145 = vector.load %arg14[%c0_52, %c0_53] : memref<1x10xf32, #tpu.memory_space<vmem>>, vector<1x10xf32>
    %cst_54 = arith.constant 0.000000e+00 : f32
    %146 = vector.broadcast %cst_54 : f32 to vector<1x10xf32>
    %147 = arith.maximumf %145, %146 : vector<1x10xf32>
    %148 = vector.broadcast %cst_54 : f32 to vector<1x10xf32>
    %149 = arith.subf %145, %148 : vector<1x10xf32>
    %150 = arith.cmpf one, %149, %149 : vector<1x10xf32>
    %151 = vector.broadcast %cst_54 : f32 to vector<1x10xf32>
    %152 = arith.addf %145, %151 : vector<1x10xf32>
    %153 = math.absf %149 : vector<1x10xf32>
    %cst_55 = arith.constant 0.000000e+00 : f32
    %154 = vector.broadcast %cst_55 : f32 to vector<1x10xf32>
    %155 = arith.subf %154, %153 : vector<1x10xf32>
    %156 = math.exp %155 : vector<1x10xf32>
    %157 = math.log1p %156 : vector<1x10xf32>
    %158 = arith.addf %147, %157 : vector<1x10xf32>
    %159 = arith.select %150, %152, %158 : vector<1x10xi1>, vector<1x10xf32>
    %c0_56 = arith.constant 0 : index
    %c0_57 = arith.constant 0 : index
    %160 = vector.load %arg15[%c0_56, %c0_57] : memref<1x10xf32, #tpu.memory_space<vmem>>, vector<1x10xf32>
    %161 = arith.mulf %159, %160 : vector<1x10xf32>
    %162 = arith.addf %144, %161 : vector<1x10xf32>
    %163 = math.log %159 : vector<1x10xf32>
    %cst_58 = arith.constant 0.000000e+00 : f32
    %164 = vector.broadcast %cst_58 : f32 to vector<1x10xf32>
    %165 = arith.subf %164, %163 : vector<1x10xf32>
    %166 = arith.mulf %159, %159 : vector<1x10xf32>
    %cst_59 = arith.constant 0.000000e+00 : f32
    %167 = vector.broadcast %cst_59 : f32 to vector<1x10xf32>
    %168 = arith.subf %144, %167 : vector<1x10xf32>
    %169 = arith.mulf %168, %168 : vector<1x10xf32>
    %170 = arith.addf %166, %169 : vector<1x10xf32>
    %cst_60 = arith.constant 5.000000e-01 : f32
    %171 = vector.broadcast %cst_60 : f32 to vector<1x10xf32>
    %172 = arith.mulf %170, %171 : vector<1x10xf32>
    %173 = arith.addf %165, %172 : vector<1x10xf32>
    %cst_61 = arith.constant 5.000000e-01 : f32
    %174 = vector.broadcast %cst_61 : f32 to vector<1x10xf32>
    %175 = arith.subf %173, %174 : vector<1x10xf32>
    %176 = vector.shape_cast %175 : vector<1x10xf32> to vector<1x1x10xf32>
    %cst_62 = arith.constant dense<0.000000e+00> : vector<1xf32>
    %177 = vector.multi_reduction <add>, %176, %cst_62 [1, 2] : vector<1x1x10xf32> to vector<1xf32>
    %178 = vector.shape_cast %177 : vector<1xf32> to vector<1x1x1xf32>
    %179 = vector.extract %178[0, 0, 0] : f32 from vector<1x1x1xf32>
    %c0_63 = arith.constant 0 : index
    %c0_64 = arith.constant 0 : index
    %180 = vector.load %arg16[%c0_63, %c0_64] : memref<1x1xf32, #tpu.memory_space<vmem>>, vector<1x1xf32>
    %c0_65 = arith.constant 0 : index
    %c0_66 = arith.constant 0 : index
    %181 = vector.load %arg17[%c0_65, %c0_66] : memref<1x1xf32, #tpu.memory_space<vmem>>, vector<1x1xf32>
    %cst_67 = arith.constant 0.000000e+00 : f32
    %182 = vector.broadcast %cst_67 : f32 to vector<1x1xf32>
    %183 = arith.maximumf %181, %182 : vector<1x1xf32>
    %184 = vector.broadcast %cst_67 : f32 to vector<1x1xf32>
    %185 = arith.subf %181, %184 : vector<1x1xf32>
    %186 = arith.cmpf one, %185, %185 : vector<1x1xf32>
    %187 = vector.broadcast %cst_67 : f32 to vector<1x1xf32>
    %188 = arith.addf %181, %187 : vector<1x1xf32>
    %189 = math.absf %185 : vector<1x1xf32>
    %cst_68 = arith.constant 0.000000e+00 : f32
    %190 = vector.broadcast %cst_68 : f32 to vector<1x1xf32>
    %191 = arith.subf %190, %189 : vector<1x1xf32>
    %192 = math.exp %191 : vector<1x1xf32>
    %193 = math.log1p %192 : vector<1x1xf32>
    %194 = arith.addf %183, %193 : vector<1x1xf32>
    %195 = arith.select %186, %188, %194 : vector<1x1xi1>, vector<1x1xf32>
    %c0_69 = arith.constant 0 : index
    %c0_70 = arith.constant 0 : index
    %196 = vector.load %arg18[%c0_69, %c0_70] : memref<1x1xf32, #tpu.memory_space<vmem>>, vector<1x1xf32>
    %197 = arith.mulf %195, %196 : vector<1x1xf32>
    %198 = arith.addf %180, %197 : vector<1x1xf32>
    %199 = math.log %195 : vector<1x1xf32>
    %cst_71 = arith.constant 0.000000e+00 : f32
    %200 = vector.broadcast %cst_71 : f32 to vector<1x1xf32>
    %201 = arith.subf %200, %199 : vector<1x1xf32>
    %202 = arith.mulf %195, %195 : vector<1x1xf32>
    %cst_72 = arith.constant 0.000000e+00 : f32
    %203 = vector.broadcast %cst_72 : f32 to vector<1x1xf32>
    %204 = arith.subf %180, %203 : vector<1x1xf32>
    %205 = arith.mulf %204, %204 : vector<1x1xf32>
    %206 = arith.addf %202, %205 : vector<1x1xf32>
    %cst_73 = arith.constant 5.000000e-01 : f32
    %207 = vector.broadcast %cst_73 : f32 to vector<1x1xf32>
    %208 = arith.mulf %206, %207 : vector<1x1xf32>
    %209 = arith.addf %201, %208 : vector<1x1xf32>
    %cst_74 = arith.constant 5.000000e-01 : f32
    %210 = vector.broadcast %cst_74 : f32 to vector<1x1xf32>
    %211 = arith.subf %209, %210 : vector<1x1xf32>
    %212 = vector.shape_cast %211 : vector<1x1xf32> to vector<1x1x1xf32>
    %cst_75 = arith.constant dense<0.000000e+00> : vector<1xf32>
    %213 = vector.multi_reduction <add>, %212, %cst_75 [1, 2] : vector<1x1x1xf32> to vector<1xf32>
    %214 = vector.shape_cast %213 : vector<1xf32> to vector<1x1x1xf32>
    %215 = vector.extract %214[0, 0, 0] : f32 from vector<1x1x1xf32>
    %c0_76 = arith.constant 0 : index
    %c0_77 = arith.constant 0 : index
    %216 = vector.load %arg0[%c0_76, %c0_77] : memref<8x13xf32, #tpu.memory_space<vmem>>, vector<8x13xf32>
    %cst_78 = arith.constant dense<0.000000e+00> : vector<8x10xf32>
    %217 = tpu.matmul %216, %18, %cst_78 {dimension_numbers = #tpu.dot_dimension_numbers<[1], [0], [0], [1], [0, 0, 1, 1], [], []>} : vector<8x13xf32>, vector<13x10xf32>, vector<8x10xf32> -> vector<8x10xf32>
    %218 = vector.broadcast %54 : vector<1x10xf32> to vector<8x10xf32>
    %219 = arith.addf %217, %218 : vector<8x10xf32>
    %220 = math.tanh %219 : vector<8x10xf32>
    %cst_79 = arith.constant dense<0.000000e+00> : vector<8x10xf32>
    %221 = tpu.matmul %220, %90, %cst_79 {dimension_numbers = #tpu.dot_dimension_numbers<[1], [0], [0], [1], [0, 0, 1, 1], [], []>} : vector<8x10xf32>, vector<10x10xf32>, vector<8x10xf32> -> vector<8x10xf32>
    %222 = vector.broadcast %126 : vector<1x10xf32> to vector<8x10xf32>
    %223 = arith.addf %221, %222 : vector<8x10xf32>
    %224 = math.tanh %223 : vector<8x10xf32>
    %225 = vector.broadcast %162 : vector<1x10xf32> to vector<8x10xf32>
    %226 = arith.mulf %224, %225 : vector<8x10xf32>
    %cst_80 = arith.constant dense<0.000000e+00> : vector<8xf32>
    %227 = vector.multi_reduction <add>, %226, %cst_80 [1] : vector<8x10xf32> to vector<8xf32>
    %228 = vector.shape_cast %227 : vector<8xf32> to vector<8x1xf32>
    %229 = vector.broadcast %198 : vector<1x1xf32> to vector<8x1xf32>
    %230 = arith.addf %228, %229 : vector<8x1xf32>
    %c0_81 = arith.constant 0 : index
    %c0_82 = arith.constant 0 : index
    %231 = vector.load %arg19[%c0_81, %c0_82] : memref<8x1xf32, #tpu.memory_space<vmem>>, vector<8x1xf32>
    tpu.vector_store %arg19[%c0_81, %c0_82], %230 {strides = array<i32>} : memref<8x1xf32, #tpu.memory_space<vmem>>, vector<8x1xf32>,
    %232 = arith.addf %35, %71 : f32
    %233 = arith.addf %232, %107 : f32
    %234 = arith.addf %233, %143 : f32
    %235 = arith.addf %234, %179 : f32
    %236 = arith.addf %235, %215 : f32
    %c0_83 = arith.constant 0 : index
    %237 = memref.load %arg20[%c0_83] : memref<1xf32, #tpu.memory_space<smem>>
    memref.store %236, %arg20[%c0_83] : memref<1xf32, #tpu.memory_space<smem>>
    return
  }
}

</mosaic_0001>

<bundles_post_ra>
// kernel: _fused_forward.3
= control target key start
LH: loop header
LB: loop body
LE: loop exit
PB: predicated region body
PF: predicated region fallthrough
CT: control target
= control target key end

     0   :  { %s827_s0 = inlined_call_operand.vmem [shape: f32[8,13], index: 0, kind: input, shape index: {}]   ;;  %s828_s1 = inlined_call_operand.vmem [shape: f32[13,10], index: 1, kind: input, shape index: {}]   ;;  %s829_s2 = inlined_call_operand.vmem [shape: f32[13,10], index: 2, kind: input, shape index: {}]   ;;  %s830_s3 = inlined_call_operand.vmem [shape: f32[13,10], index: 3, kind: input, shape index: {}]   ;;  %s831_s4 = inlined_call_operand.vmem [shape: f32[1,10], index: 4, kind: input, shape index: {}]   ;;  %s832_s5 = inlined_call_operand.vmem [shape: f32[1,10], index: 5, kind: input, shape index: {}]   ;;  %s833_s6 = inlined_call_operand.vmem [shape: f32[1,10], index: 6, kind: input, shape index: {}]   ;;  %s834_s7 = inlined_call_operand.vmem [shape: f32[10,10], index: 7, kind: input, shape index: {}]   ;;  %s835_s8 = inlined_call_operand.vmem [shape: f32[10,10], index: 8, kind: input, shape index: {}]   ;;  %s836_s9 = inlined_call_operand.vmem [shape: f32[10,10], index: 9, kind: input, shape index: {}]   ;;  %s837_s10 = inlined_call_operand.vmem [shape: f32[1,10], index: 10, kind: input, shape index: {}]   ;;  %s838_s11 = inlined_call_operand.vmem [shape: f32[1,10], index: 11, kind: input, shape index: {}]   ;;  %s839_s12 = inlined_call_operand.vmem [shape: f32[1,10], index: 12, kind: input, shape index: {}]   ;;  %s840_s13 = inlined_call_operand.vmem [shape: f32[1,10], index: 13, kind: input, shape index: {}]   ;;  %s841_s14 = inlined_call_operand.vmem [shape: f32[1,10], index: 14, kind: input, shape index: {}]   ;;  %s842_s15 = inlined_call_operand.vmem [shape: f32[1,10], index: 15, kind: input, shape index: {}]   ;;  %s843_s16 = inlined_call_operand.<no memory space> [shape: f32[1,1], index: 16, kind: input, shape index: {}]   ;;  %s844_s19 = inlined_call_operand.vmem [shape: f32[8,1], index: 19, kind: output, shape index: {0}]   ;;  %s845_s20 = inlined_call_operand.hbm [shape: f32[1], index: 20, kind: output, shape index: {1}]   ;;  %s846_s17 = inlined_call_operand.<no memory space> [shape: f32[1,1], index: 17, kind: input, shape index: {}]   ;;  %s847_s18 = inlined_call_operand.<no memory space> [shape: f32[1,1], index: 18, kind: input, shape index: {}]  }
   0x1   :  { %851 = sst [smem:[#allocation8_spill]] %s827_s0  ;;  %v26_v0 = vstv %s843_s16  ;;  %v28_v1 = vstv %s846_s17  ;;  %v30_v2 = vstv %s847_s18 }
   0x2   :  { %852 = sst [smem:[#allocation9_spill]] %s828_s1  ;;  %27 = vst [vmem:[#allocation2] sm:$0x1] %v26_v0 }
   0x3   :  { %853 = sst [smem:[#allocation10_spill]] %s829_s2  ;;  %29 = vst [vmem:[#allocation3] sm:$0x1] %v28_v1 }
   0x4   :  { %854 = sst [smem:[#allocation11_spill]] %s830_s3  ;;  %31 = vst [vmem:[#allocation4] sm:$0x1] %v30_v2 }
   0x5   :  { %855 = sst [smem:[#allocation12_spill]] %s831_s4 }
   0x6   :  { %s856_s27 = sld [smem:[#allocation10_spill]] }
   0xc   :  { %v74_v3 = vld [vmem:[%s856_s27 + $0x8] sm:$0x1f]  ;;  %v73_v5 = vld [vmem:[%s856_s27] sm:$0xff] }
   0xd   :  { %v82_v4 = vand.u32 2147483647, %v74_v3  ;;  %v81_v6 = vand.u32 2147483647, %v73_v5 }
   0xe   :  { %32 = vsyncpa [#allocation6], 0  ;;  %v76_v23 = vmax.f32 %v74_v3, 0.0  ;;  %v75_v27 = vmax.f32 %v73_v5, 0.0  ;;  %vm78_vm2 = vcmp.ne.f32.partialorder %v74_v3, %v74_v3  ;;  %s857_s18 = sld [smem:[#allocation11_spill]]  ;;  %vm77_vm3 = vcmp.ne.f32.partialorder %v73_v5, %v73_v5  ;;  %v194_v50 = vld [vmem:[%s835_s8] sm:$0xff] }
   0xf   :  { %v84_v7 = vsub.f32 0.0, %v82_v4  ;;  %v83_v8 = vsub.f32 0.0, %v81_v6  ;;  %s858_s1 = sld [smem:[#allocation9_spill]]  ;;  %vm395_vm4 = vcmask 1044480   ;;  %vm391_vm5 = vcmask 105472   ;;  %s478_s30 = sshll.u32 %s845_s20, 4  ;;  %s479_s30 = int_to_ptr.hbm [resolvable:$true] %s478_s30 }
  0x10   :  { %s859_s25 = sld [smem:[#allocation8_spill]]  ;;  %v732_v44 = vld [vmem:[%s832_s5] sm:$0x1]  ;;  %v195_v48 = vld [vmem:[%s835_s8 + $0x8] sm:$0x3]  ;;  %vm198_vm10 = vcmp.ne.f32.partialorder %v194_v50, %v194_v50  ;;  %vm426_vm11 = vcmask 1041408  }
  0x11   :  { %v87_v9 = vmul.f32 1.442695, %v84_v7  ;;  %v85_v10 = vmul.f32 1.442695, %v83_v8  ;;  %v154_v45 = vand.u32 2147483647, %v732_v44  ;;  %vm199_vm8 = vcmp.ne.f32.partialorder %v195_v48, %v195_v48 }
  0x12   :  { %v203_v49 = vand.u32 2147483647, %v195_v48  ;;  %v202_v52 = vand.u32 2147483647, %v194_v50  ;;  %vm152_vm12 = vcmp.ne.f32.partialorder %v732_v44, %v732_v44  ;;  %vm137_vm13 = vcmask 77824  }
  0x13   :  { %515 = vpow2.f32 %v87_v9  ;;  %v155_v46 = vsub.f32 0.0, %v154_v45  ;;  %vm135_vm14 = vcmask 80896   ;;  %vm257_vm15 = vcmask 74752  }
  0x14   :  { %517 = vpow2.f32 %v85_v10  ;;  %v112_v31 = vld [vmem:[%s857_s18 + $0x8] sm:$0x1f]  ;;  %v111_v34 = vld [vmem:[%s857_s18] sm:$0xff]  ;;  %v205_v51 = vsub.f32 0.0, %v203_v49  ;;  %v204_v54 = vsub.f32 0.0, %v202_v52 }
  0x15   :  { %v711_v35 = vld [vmem:[%s858_s1 + $0x8] sm:$0x1f]  ;;  %v719_v38 = vld [vmem:[%s858_s1] sm:$0xff]  ;;  %v156_v47 = vmul.f32 1.442695, %v155_v46  ;;  %s862_s1 = sld [smem:[#allocation12_spill]] }
  0x16   :  { %v387_v43 = vld [vmem:[%s859_s25] sm:$0xff]  ;;  %v208_v53 = vmul.f32 1.442695, %v205_v51  ;;  %v206_v55 = vmul.f32 1.442695, %v204_v54 }
  0x19   :  { %v516_v11 = vpop.eup %515 }
  0x1a   :  { %v518_v12 = vpop.eup %517  ;;  %v98_v13 = vadd.f32 1.0, %v516_v11  ;;  %v101_v14 = vmul.f32 -0.5, %v516_v11  ;;  %v104_v18 = vand.u32 2147483647, %v516_v11 }
  0x1b   :  { %v89_v15 = vadd.f32 1.0, %v518_v12  ;;  %v92_v16 = vmul.f32 -0.5, %v518_v12  ;;  %v95_v20 = vand.u32 2147483647, %v518_v12  ;;  %v149_v45 = vld [vmem:[%s862_s1] sm:$0x1] }
  0x1c   :  { %519 = vlog2.f32 %v98_v13  ;;  %v102_v17 = vadd.f32 1.0, %v101_v14  ;;  %vm105_vm0 = vcmp.lt.f32.partialorder %v104_v18, 0.0004427343  ;;  %v176_v46 = vmul.f32 %v149_v45, %v149_v45  ;;  %s581_s1 = smov [#allocation5]  }
  0x1d   :  { %521 = vlog2.f32 %v89_v15  ;;  %v93_v19 = vadd.f32 1.0, %v92_v16  ;;  %vm96_vm1 = vcmp.lt.f32.partialorder %v95_v20, 0.0004427343 }
  0x1e   :  { %v103_v21 = vmul.f32 %v516_v11, %v102_v17  ;;  %523 = vpow2.f32 %v156_v47  ;;  %v197_v11 = vmax.f32 %v195_v48, 0.0  ;;  %v196_v17 = vmax.f32 %v194_v50, 0.0 }
  0x1f   :  { %v94_v24 = vmul.f32 %v518_v12, %v93_v19  ;;  %525 = vpow2.f32 %v208_v53 }
  0x20   :  { %527 = vpow2.f32 %v206_v55 }
  0x22   :  { %v520_v22 = vpop.eup %519 }
  0x23   :  { %v522_v25 = vpop.eup %521  ;;  %v100_v26 = vmul.f32 0.6931472, %v520_v22 }
  0x24   :  { %v91_v28 = vmul.f32 0.6931472, %v522_v25  ;;  %v524_v56 = vpop.eup %523  ;;  %v193_v25 = vld [vmem:[%s834_s7 + $0x8] sm:$0x3] }
  0x25   :  { %v106_v29 = vsel %vm105_vm0, %v103_v21, %v100_v26  ;;  %v526_v57 = vpop.eup %525  ;;  %v158_v58 = vadd.f32 1.0, %v524_v56  ;;  %v161_v62 = vmul.f32 -0.5, %v524_v56  ;;  %vm181_vm0 = vcmask 73728  }
  0x26   :  { %v108_v30 = vadd.f32 %v106_v29, %v76_v23  ;;  %v97_v32 = vsel %vm96_vm1, %v94_v24, %v91_v28  ;;  %v219_v59 = vadd.f32 1.0, %v526_v57  ;;  %v528_v60 = vpop.eup %527  ;;  %v222_v63 = vmul.f32 -0.5, %v526_v57  ;;  %v233_v23 = vld [vmem:[%s836_s9 + $0x8] sm:$0x3]  ;;  %v192_v29 = vld [vmem:[%s834_s7] sm:$0xff] }
  0x27   :  { %v107_v33 = vadd.f32 %v97_v32, %v75_v27  ;;  %v210_v61 = vadd.f32 1.0, %v528_v60  ;;  %v213_v1 = vmul.f32 -0.5, %v528_v60  ;;  %v225_v4 = vand.u32 2147483647, %v526_v57  ;;  %v232_v27 = vld [vmem:[%s836_s9] sm:$0xff] }
  0x28   :  { %v713_v36 = vsel %vm78_vm2, %v74_v3, %v108_v30  ;;  %529 = vlog2.f32 %v219_v59  ;;  %v223_v0 = vadd.f32 1.0, %v222_v63  ;;  %v164_v3 = vand.u32 2147483647, %v524_v56 }
  0x29   :  { %v114_v37 = vmul.f32 %v112_v31, %v713_v36  ;;  %v721_v39 = vsel %vm77_vm3, %v73_v5, %v107_v33  ;;  %531 = vlog2.f32 %v158_v58  ;;  %v162_v6 = vadd.f32 1.0, %v161_v62 }
  0x2a   :  { %v113_v40 = vmul.f32 %v111_v34, %v721_v39  ;;  %533 = vlog2.f32 %v210_v61  ;;  %v224_v8 = vmul.f32 %v526_v57, %v223_v0  ;;  %v214_v9 = vadd.f32 1.0, %v213_v1 }
  0x2b   :  { %v116_v41 = vadd.f32 %v114_v37, %v711_v35  ;;  %vm226_vm6 = vcmp.lt.f32.partialorder %v225_v4, 0.0004427343  ;;  %v216_v12 = vand.u32 2147483647, %v528_v60  ;;  %v163_v19 = vmul.f32 %v524_v56, %v162_v6  ;;  %v169_v56 = vld [vmem:[%s833_s6] sm:$0x1] }
  0x2c   :  { %v115_v42 = vadd.f32 %v113_v40, %v719_v38  ;;  %v215_v15 = vmul.f32 %v528_v60, %v214_v9  ;;  %vm741_vm9 = vcmp.lt.f32.partialorder %v164_v3, 0.0004427343  ;;  %v151_v28 = vmax.f32 %v732_v44, 0.0 }
  0x2d   :  { %498 = vmatpush.msk.msra.mxu0 %vm395_vm4, %v116_v41  ;;  %vm217_vm7 = vcmp.lt.f32.partialorder %v216_v12, 0.0004427343  ;;  %v123_v40 = vmul.f32 %v721_v39, %v721_v39  ;;  %v125_v41 = vmul.f32 %v719_v38, %v719_v38  ;;  %535 = vlog2.f32 %v721_v39  ;;  %v778_v38 = vld [vmem:[%s838_s11] sm:$0x1] }
  0x2e   :  { %v530_v2 = vpop.eup %529  ;;  %537 = vlog2.f32 %v713_v36  ;;  %v274_v39 = vand.u32 2147483647, %v778_v38  ;;  %vm272_vm2 = vcmp.ne.f32.partialorder %v778_v38, %v778_v38 }
  0x2f   :  { %414 = vmatpush.msra.mxu0 %v115_v42  ;;  %v532_v5 = vpop.eup %531  ;;  %v221_v7 = vmul.f32 0.6931472, %v530_v2  ;;  %v124_v42 = vmul.f32 %v713_v36, %v713_v36  ;;  %v127_v51 = vadd.f32 %v125_v41, %v123_v40 }
  0x30   :  { %499 = vmatmul.msk.f32.vlgmr.msra.gmra.mxu0 %vm391_vm5, %v387_v43  ;;  %v534_v10 = vpop.eup %533  ;;  %v160_v18 = vmul.f32 0.6931472, %v532_v5  ;;  %v126_v43 = vmul.f32 %v711_v35, %v711_v35  ;;  %v247_v35 = vmul.f32 %v193_v25, %v193_v25  ;;  %v275_v55 = vsub.f32 0.0, %v274_v39  ;;  %v269_v39 = vld [vmem:[%s837_s10] sm:$0x1] }
  0x31   :  { %v227_v13 = vsel %vm226_vm6, %v224_v8, %v221_v7  ;;  %v212_v14 = vmul.f32 0.6931472, %v534_v10  ;;  %v129_v59 = vmul.f32 0.5, %v127_v51  ;;  %v271_v51 = vmax.f32 %v778_v38, 0.0 }
  0x32   :  { %v229_v16 = vadd.f32 %v227_v13, %v197_v11  ;;  %v166_v31 = vsel %vm741_vm9, %v163_v19, %v160_v18  ;;  %v128_v53 = vadd.f32 %v126_v43, %v124_v42  ;;  %v276_v61 = vmul.f32 1.442695, %v275_v55 }
  0x33   :  { %v218_v20 = vsel %vm217_vm7, %v215_v15, %v212_v14  ;;  %v167_v37 = vadd.f32 %v166_v31, %v151_v28  ;;  %v536_v36 = vpop.eup %535  ;;  %vm462_vm7 = vcmask 7168  }
  0x34   :  { %v231_v22 = vsel %vm199_vm8, %v195_v48, %v229_v16  ;;  %v228_v24 = vadd.f32 %v218_v20, %v196_v17  ;;  %v246_v48 = vmul.f32 %v192_v29, %v192_v29  ;;  %v538_v58 = vpop.eup %537  ;;  %v130_v0 = vmul.f32 0.5, %v128_v53 }
  0x35   :  { %v235_v26 = vmul.f32 %v233_v23, %v231_v22  ;;  %v168_v49 = vsel %vm152_vm12, %v732_v44, %v167_v37  ;;  %v118_v44 = vmul.f32 0.6931472, %v536_v36  ;;  %v120_v63 = vmul.f32 0.6931472, %v538_v58 }
  0x36   :  { %v230_v30 = vsel %vm198_vm10, %v194_v50, %v228_v24  ;;  %v245_v50 = vmul.f32 %v231_v22, %v231_v22  ;;  %v175_v52 = vmul.f32 %v168_v49, %v168_v49  ;;  %v170_v6 = vmul.f32 %v169_v56, %v168_v49 }
  0x37   :  { %v237_v32 = vadd.f32 %v235_v26, %v193_v25  ;;  %v234_v33 = vmul.f32 %v232_v27, %v230_v30  ;;  %v244_v47 = vmul.f32 %v230_v30, %v230_v30  ;;  %539 = vlog2.f32 %v230_v30  ;;  %v789_v30 = vld [vmem:[%s841_s14] sm:$0x1] }
  0x38   :  { %541 = vlog2.f32 %v231_v22  ;;  %v249_v57 = vadd.f32 %v247_v35, %v245_v50  ;;  %v177_v60 = vadd.f32 %v176_v46, %v175_v52  ;;  %v121_v2 = vsub.f32 0.0, %v118_v44  ;;  %v289_v44 = vld [vmem:[%s839_s12] sm:$0x1] }
  0x39   :  { %500 = vmatpush.msk.msra.mxu1 %vm426_vm11, %v237_v32  ;;  %v236_v34 = vadd.f32 %v234_v33, %v192_v29  ;;  %543 = vlog2.f32 %v168_v49  ;;  %v248_v54 = vadd.f32 %v246_v48, %v244_v47  ;;  %v122_v7 = vsub.f32 0.0, %v120_v63 }
  0x3a   :  { %545 = vpow2.f32 %v276_v61  ;;  %v251_v9 = vmul.f32 0.5, %v249_v57  ;;  %v131_v10 = vadd.f32 %v129_v59, %v121_v2  ;;  %v178_v13 = vmul.f32 0.5, %v177_v60 }
  0x3b   :  { %445 = vmatpush.msra.mxu1 %v236_v34  ;;  %v250_v4 = vmul.f32 0.5, %v248_v54  ;;  %v132_v14 = vadd.f32 %v130_v0, %v122_v7  ;;  %v171_v19 = vadd.f32 %v170_v6, %v149_v45  ;;  %v316_v41 = vand.u32 2147483647, %v789_v30 }
  0x3c   :  { %v490_v16 = vadd.f32 -0.5, %v131_v10  ;;  %v296_v36 = vmul.f32 %v269_v39, %v269_v39  ;;  %v313_v7 = vmax.f32 %v789_v30, 0.0  ;;  %vm314_vm4 = vcmp.ne.f32.partialorder %v789_v30, %v789_v30 }
  0x3d   :  { %v540_v62 = vpop.eup %539  ;;  %v491_v20 = vadd.f32 -0.5, %v132_v14  ;;  %v389_v34 = vperm.slane %v171_v19, 0  ;;  %v317_v45 = vsub.f32 0.0, %v316_v41 }
  0x3e   :  { %v542_v1 = vpop.eup %541  ;;  %v239_v3 = vmul.f32 0.6931472, %v540_v62  ;;  %v136_v23 = vsel %vm135_vm14, %v490_v16, 0.0 }
  0x3f   :  { %v544_v5 = vpop.eup %543  ;;  %v241_v8 = vmul.f32 0.6931472, %v542_v1  ;;  %v138_v26 = vsel %vm137_vm13, %v491_v20, 0.0  ;;  %v318_v49 = vmul.f32 1.442695, %v317_v45 }
  0x40   :  { %v242_v11 = vsub.f32 0.0, %v239_v3  ;;  %v173_v12 = vmul.f32 0.6931472, %v544_v5  ;;  %v546_v22 = vpop.eup %545  ;;  %v139_v31 = vadd.f32 %v138_v26, %v136_v23 }
  0x41   :  { %v243_v15 = vsub.f32 0.0, %v241_v8  ;;  %v278_v28 = vadd.f32 1.0, %v546_v22  ;;  %v281_v29 = vmul.f32 -0.5, %v546_v22  ;;  %v284_v43 = vand.u32 2147483647, %v546_v22 }
  0x42   :  { %v252_v17 = vadd.f32 %v250_v4, %v242_v11  ;;  %v174_v18 = vsub.f32 0.0, %v173_v12  ;;  %140 = vadd.xlane.f32.xlu0 %v139_v31  ;;  %v311_v11 = vld [vmem:[%s840_s13] sm:$0x1] }
  0x43   :  { %v253_v21 = vadd.f32 %v251_v9, %v243_v15  ;;  %547 = vlog2.f32 %v278_v28  ;;  %v282_v40 = vadd.f32 1.0, %v281_v29  ;;  %vm285_vm1 = vcmp.lt.f32.partialorder %v284_v43, 0.0004427343 }
  0x44   :  { %v493_v24 = vadd.f32 -0.5, %v252_v17  ;;  %v179_v25 = vadd.f32 %v178_v13, %v174_v18  ;;  %v338_v16 = vmul.f32 %v311_v11, %v311_v11 }
  0x45   :  { %v494_v27 = vadd.f32 -0.5, %v253_v21  ;;  %v283_v48 = vmul.f32 %v546_v22, %v282_v40 }
  0x46   :  { %v256_v32 = vsel %vm135_vm14, %v493_v24, 0.0  ;;  %v492_v42 = vadd.f32 -0.5, %v179_v25 }
  0x47   :  { %v258_v33 = vsel %vm257_vm15, %v494_v27, 0.0 }
  0x48   :  { %v259_v37 = vadd.f32 %v258_v33, %v256_v32  ;;  %v182_v35 = vsel %vm181_vm0, %v492_v42, 0.0 }
  0x49   :  { %v548_v50 = vpop.eup %547 }
  0x4a   :  { %260 = vadd.xlane.f32.xlu1 %v259_v37  ;;  %v280_v52 = vmul.f32 0.6931472, %v548_v50  ;;  %183 = vadd.xlane.f32.xlu0 %v182_v35 }
  0x4c   :  { %v286_v53 = vsel %vm285_vm1, %v283_v48, %v280_v52 }
  0x4d   :  { %v287_v54 = vadd.f32 %v286_v53, %v271_v51 }
  0x4f   :  { %v288_v55 = vsel %vm272_vm2, %v778_v38, %v287_v54 }
  0x50   :  { %v295_v57 = vmul.f32 %v288_v55, %v288_v55  ;;  %v290_v62 = vmul.f32 %v289_v44, %v288_v55 }
  0x52   :  { %v297_v61 = vadd.f32 %v296_v36, %v295_v57  ;;  %v805_v0 = vadd.f32 %v290_v62, %v269_v39 }
  0x54   :  { %v298_v3 = vmul.f32 0.5, %v297_v61  ;;  %v421_v35 = vperm.slane %v805_v0, 0 }
  0xad   :  { %v416_v46 = vpop.f32.mrf.mxu0 }
  0xae   :  { %v417_v47 = vadd.f32 %v416_v46, %v389_v34 }
  0xb0   :  { %549 = vtanh.f32 %v417_v47  ;;  %v331_v47 = vld [vmem:[%s842_s15] sm:$0x1] }
  0xb1   :  { %551 = vpow2.f32 %v318_v49 }
  0xb2   :  { %553 = vlog2.f32 %v288_v55 }
  0xb5   :  { %v141_v26 = vpop.xlane.xlu0 %140 }
  0xb6   :  { %v550_v56 = vpop.eup %549  ;;  %v142_v28 = vrot.slane %v141_v26, 4 }
  0xb7   :  { %v552_v58 = vpop.eup %551  ;;  %501 = vmatmul.msk.f32.vlgmr.msra.gmra.mxu1 %vm135_vm14, %v550_v56 }
  0xb8   :  { %v320_v59 = vadd.f32 1.0, %v552_v58  ;;  %v323_v60 = vmul.f32 -0.5, %v552_v58  ;;  %v554_v38 = vpop.eup %553  ;;  %v326_v1 = vand.u32 2147483647, %v552_v58  ;;  %v143_v31 = vadd.f32 %v142_v28, %v141_v26 }
  0xb9   :  { %v293_v2 = vmul.f32 0.6931472, %v554_v38 }
  0xba   :  { %555 = vlog2.f32 %v320_v59  ;;  %v324_v63 = vadd.f32 1.0, %v323_v60  ;;  %vm327_vm3 = vcmp.lt.f32.partialorder %v326_v1, 0.0004427343  ;;  %v144_v40 = vrot.slane %v143_v31, 2 }
  0xbb   :  { %v294_v4 = vsub.f32 0.0, %v293_v2 }
  0xbc   :  { %v325_v5 = vmul.f32 %v552_v58, %v324_v63  ;;  %v145_v48 = vadd.f32 %v144_v40, %v143_v31 }
  0xbd   :  { %v299_v8 = vadd.f32 %v298_v3, %v294_v4  ;;  %v261_v27 = vpop.xlane.xlu1 %260  ;;  %v184_v33 = vpop.xlane.xlu0 %183 }
  0xbe   :  { %v262_v29 = vrot.slane %v261_v27, 4  ;;  %v185_v37 = vrot.slane %v184_v33, 4  ;;  %v146_v51 = vrot.slane %v145_v48, 1 }
  0xbf   :  { %v495_v10 = vadd.f32 -0.5, %v299_v8 }
  0xc0   :  { %v556_v6 = vpop.eup %555  ;;  %v263_v32 = vadd.f32 %v262_v29, %v261_v27  ;;  %v186_v43 = vadd.f32 %v185_v37, %v184_v33  ;;  %v147_v54 = vadd.f32 %v146_v51, %v145_v48 }
  0xc1   :  { %v322_v9 = vmul.f32 0.6931472, %v556_v6  ;;  %v301_v14 = vsel %vm181_vm0, %v495_v10, 0.0 }
  0xc2   :  { %302 = vadd.xlane.f32.xlu1 %v301_v14  ;;  %v264_v41 = vrot.slane %v263_v32, 2  ;;  %v187_v46 = vrot.slane %v186_v43, 2  ;;  %502 = vpush %v147_v54 }
  0xc3   :  { %v328_v12 = vsel %vm327_vm3, %v325_v5, %v322_v9 }
  0xc4   :  { %v329_v13 = vadd.f32 %v328_v12, %v313_v7  ;;  %v265_v49 = vadd.f32 %v264_v41, %v263_v32  ;;  %v188_v50 = vadd.f32 %v187_v46, %v186_v43 }
  0xc6   :  { %v330_v15 = vsel %vm314_vm4, %v789_v30, %v329_v13  ;;  %v354_v30 = vld [vmem:[#allocation3] sm:$0x1]  ;;  %v266_v52 = vrot.slane %v265_v49, 1  ;;  %v189_v53 = vrot.slane %v188_v50, 1 }
  0xc7   :  { %557 = vlog2.f32 %v330_v15  ;;  %v337_v17 = vmul.f32 %v330_v15, %v330_v15  ;;  %v358_v34 = vand.u32 2147483647, %v354_v30  ;;  %v332_v39 = vmul.f32 %v331_v47, %v330_v15 }
  0xc8   :  { %v267_v55 = vadd.f32 %v266_v52, %v265_v49  ;;  %v190_v56 = vadd.f32 %v189_v53, %v188_v50  ;;  %v355_v7 = vmax.f32 %v354_v30, 0.0  ;;  %vm356_vm6 = vcmp.ne.f32.partialorder %v354_v30, %v354_v30 }
  0xc9   :  { %v339_v18 = vadd.f32 %v338_v16, %v337_v17  ;;  %v359_v42 = vsub.f32 0.0, %v358_v34  ;;  %v333_v44 = vadd.f32 %v332_v39, %v311_v11  ;;  %v353_v11 = vld [vmem:[#allocation2] sm:$0x1] }
  0xca   :  { %504 = vpush %v190_v56  ;;  %v380_v17 = vmul.f32 %v353_v11, %v353_v11 }
  0xcb   :  { %v340_v21 = vmul.f32 0.5, %v339_v18  ;;  %v360_v45 = vmul.f32 1.442695, %v359_v42  ;;  %506 = vpush %v267_v55  ;;  %v452_v63 = vperm.slane %v333_v44, 0 }
  0xcd   :  { %v558_v19 = vpop.eup %557  ;;  %559 = vpow2.f32 %v360_v45 }
  0xce   :  { %v335_v20 = vmul.f32 0.6931472, %v558_v19 }
  0xd0   :  { %v336_v22 = vsub.f32 0.0, %v335_v20 }
  0xd2   :  { %v341_v23 = vadd.f32 %v340_v21, %v336_v22 }
  0xd3   :  { %v560_v57 = vpop.eup %559 }
  0xd4   :  { %v496_v24 = vadd.f32 -0.5, %v341_v23  ;;  %v362_v59 = vadd.f32 1.0, %v560_v57  ;;  %v365_v60 = vmul.f32 -0.5, %v560_v57  ;;  %v368_v38 = vand.u32 2147483647, %v560_v57 }
  0xd6   :  { %v343_v25 = vsel %vm181_vm0, %v496_v24, 0.0  ;;  %v366_v62 = vadd.f32 1.0, %v365_v60  ;;  %vm369_vm5 = vcmp.lt.f32.partialorder %v368_v38, 0.0004427343 }
  0xd7   :  { %344 = vadd.xlane.f32.xlu2 %v343_v25 }
  0xd8   :  { %v367_v3 = vmul.f32 %v560_v57, %v366_v62 }
  0xf3   :  { %s503_s15 = spop %502 }
  0xfb   :  { %s505_s28 = spop %504 }
  0xfc   :  { %s464_s4 = sadd.f32 %s505_s28, %s503_s15  ;;  %s507_s16 = spop %506 }
  0xfe   :  { %s465_s5 = sadd.f32 %s507_s16, %s464_s4 }
 0x134   :  { %v447_v36 = vpop.f32.mrf.mxu1 }
 0x135   :  { %v448_v58 = vadd.f32 %v447_v36, %v421_v35  ;;  %v303_v61 = vpop.xlane.xlu1 %302 }
 0x136   :  { %v304_v0 = vrot.slane %v303_v61, 4 }
 0x137   :  { %561 = vtanh.f32 %v448_v58 }
 0x138   :  { %563 = vlog2.f32 %v362_v59  ;;  %v305_v1 = vadd.f32 %v304_v0, %v303_v61 }
 0x13a   :  { %v306_v6 = vrot.slane %v305_v1, 2 }
 0x13c   :  { %v307_v10 = vadd.f32 %v306_v6, %v305_v1 }
 0x13d   :  { %v562_v2 = vpop.eup %561 }
 0x13e   :  { %v564_v4 = vpop.eup %563  ;;  %v454_v5 = vmul.f32 %v562_v2, %v452_v63  ;;  %v308_v13 = vrot.slane %v307_v10, 1 }
 0x13f   :  { %v364_v8 = vmul.f32 0.6931472, %v564_v4 }
 0x140   :  { %v455_v9 = vsel %vm135_vm14, %v454_v5, 0.0  ;;  %v309_v15 = vadd.f32 %v308_v13, %v307_v10 }
 0x141   :  { %456 = vadd.xlane.f32.xlu2 %v455_v9  ;;  %v370_v12 = vsel %vm369_vm5, %v367_v3, %v364_v8 }
 0x142   :  { %v371_v14 = vadd.f32 %v370_v12, %v355_v7  ;;  %508 = vpush %v309_v15 }
 0x144   :  { %v372_v16 = vsel %vm356_vm6, %v354_v30, %v371_v14  ;;  %v373_v30 = vld [vmem:[#allocation4] sm:$0x1] }
 0x145   :  { %565 = vlog2.f32 %v372_v16  ;;  %v379_v18 = vmul.f32 %v372_v16, %v372_v16  ;;  %v374_v34 = vmul.f32 %v373_v30, %v372_v16 }
 0x147   :  { %v381_v19 = vadd.f32 %v380_v17, %v379_v18  ;;  %v375_v37 = vadd.f32 %v374_v34, %v353_v11 }
 0x149   :  { %v382_v24 = vmul.f32 0.5, %v381_v19  ;;  %v459_v40 = vperm.slane %v375_v37, 0 }
 0x14a   :  { %v345_v20 = vpop.xlane.xlu2 %344 }
 0x14b   :  { %v566_v21 = vpop.eup %565  ;;  %v346_v22 = vrot.slane %v345_v20, 4 }
 0x14c   :  { %v377_v23 = vmul.f32 0.6931472, %v566_v21 }
 0x14d   :  { %v347_v25 = vadd.f32 %v346_v22, %v345_v20 }
 0x14e   :  { %v378_v26 = vsub.f32 0.0, %v377_v23 }
 0x14f   :  { %v348_v27 = vrot.slane %v347_v25, 2 }
 0x150   :  { %v383_v28 = vadd.f32 %v382_v24, %v378_v26 }
 0x151   :  { %v349_v29 = vadd.f32 %v348_v27, %v347_v25 }
 0x152   :  { %v497_v32 = vadd.f32 -0.5, %v383_v28 }
 0x153   :  { %v350_v31 = vrot.slane %v349_v29, 1 }
 0x155   :  { %v351_v33 = vadd.f32 %v350_v31, %v349_v29 }
 0x157   :  { %510 = vpush %v351_v33 }
 0x158   :  { %512 = vpush %v497_v32 }
 0x173   :  { %s509_s8 = spop %508 }
 0x174   :  { %s466_s17 = sadd.f32 %s509_s8, %s465_s5 }
 0x188   :  { %s511_s0 = spop %510 }
 0x189   :  { %s467_s21 = sadd.f32 %s511_s0, %s466_s17  ;;  %s513_s7 = spop %512 }
 0x18b   :  { %s468_s9 = sadd.f32 %s513_s7, %s467_s21 }
 0x18d   :  { %470 = sst [smem:[#allocation5]] %s468_s9 }
 0x18e   :  { %481 = dma.smem_to_hbm %s581_s1, 16, %s479_s30, [#allocation6]  }
 0x1b4   :  { %v457_v41 = vpop.xlane.xlu2 %456 }
 0x1b5   :  { %v461_v42 = vadd.f32 %v459_v40, %v457_v41 }
 0x1b7   :  { %463 = vst.msk [vmem:[%s844_s19] sm:$0xff] %vm462_vm7, %v461_v42 }
 0x1b8   :  { %579 = dma.done.wait [#allocation6], 16  }
 0x1b9   :  { %580 = vsyncadd [#allocation6], 4294967280 }
 0x1ba   :  { %488 = sfence }
 0x1bb   :  { %489 = vsyncpa [#allocation6], 1 }

</bundles_post_ra>
